<compile_context>
chip_gen: v7x
topology: tpu7x:2x2x1
jax: 0.10.0
libtpu: 0.0.40
codegen_flags: <defaults>
</compile_context>

<pallas_src>
import functools

import jax
import jax.numpy as jnp
from jax.experimental import pallas as pl
from jax.experimental.pallas import tpu as pltpu

_NEG_SLOPE = 0.01
_LANE = 128
_SUBLANE = 8


def _leaky_relu(x, negative_slope=_NEG_SLOPE):
    return jnp.where(x >= 0, x, negative_slope * x)


def _round_up(x, m):
    return ((x + m - 1) // m) * m


def _mlp_kernel(x_ref, w1_ref, b1_ref, w2_ref, b2_ref, w3_ref, b3_ref, o_ref):
    # Fused 3-layer MLP on one batch tile: matmuls + bias adds + leaky_relu.
    x = x_ref[...].astype(jnp.float32)
    in_dim = x_ref.shape[1]
    w1 = w1_ref[...]

    if in_dim <= 8:
        # K is tiny (input = (wealth, time_left)) -> skip the MXU entirely and
        # use VPU broadcast multiply-adds; avoids vmatmul push + FIFO pop latency.
        h1 = x[:, 0:1] * w1[0:1, :]
        for d in range(1, in_dim):
            h1 = h1 + x[:, d:d + 1] * w1[d:d + 1, :]
    else:
        h1 = jnp.dot(x, w1, preferred_element_type=jnp.float32)
    h1 = _leaky_relu(h1 + b1_ref[...])

    h2 = jnp.dot(h1, w2_ref[...], preferred_element_type=jnp.float32) + b2_ref[...]
    h2 = _leaky_relu(h2)

    # w3/b3 arrive lane-padded to a multiple of 128 -> dense, unmasked stores.
    h3 = jnp.dot(h2, w3_ref[...], preferred_element_type=jnp.float32) + b3_ref[...]
    h3 = _leaky_relu(h3)

    o_ref[...] = h3.astype(o_ref.dtype)


@functools.partial(jax.jit, static_argnames=("block_b",))
def value_func_network_forward(obs, params, *, block_b=1024):
    """Run the fused MLP Pallas kernel.

    obs:    [B, input_dim] float32
    params: dict with w1 [in, fc1], b1 [1, fc1], w2 [fc1, fc2], b2 [1, fc2],
            w3 [fc2, n_ret], b3 [1, n_ret]
    returns [B, n_ret] float32
    """
    obs = jnp.asarray(obs, jnp.float32)
    B, in_dim = obs.shape
    fc1 = params["w1"].shape[1]
    fc2 = params["w2"].shape[1]
    n_ret = params["w3"].shape[1]

    # Lane-dense output: zero-pad the last layer to a multiple of 128 lanes so
    # the kernel's output store is an unmasked vst; slice back afterwards
    # (fused into the jitted graph).
    n_pad = _round_up(n_ret, _LANE)
    w3p = jnp.zeros((fc2, n_pad), jnp.float32).at[:, :n_ret].set(
        params["w3"].astype(jnp.float32))
    b3p = jnp.zeros((1, n_pad), jnp.float32).at[:, :n_ret].set(
        params["b3"].astype(jnp.float32))

    # Batch tile: multiple of the f32 sublane (8), capped so the working set
    # (x + h1 + h2 + padded output tile, double-buffered input/output) stays
    # far below the scoped VMEM limit on every generation (incl. v7x 64 MiB).
    tb = min(_round_up(block_b, _SUBLANE), _round_up(B, _SUBLANE))
    grid = (pl.cdiv(B, tb),)

    vmem = pltpu.MemorySpace.VMEM

    def batch_spec(cols):
        return pl.BlockSpec((tb, cols), lambda i: (i, 0), memory_space=vmem)

    def resident_spec(a):
        # Weights / biases: full-array block, constant index_map -> fetched
        # once into VMEM and reused across all batch tiles.
        return pl.BlockSpec(a.shape, lambda i: (0, 0), memory_space=vmem)

    weights = (params["w1"].astype(jnp.float32), params["b1"].astype(jnp.float32),
               params["w2"].astype(jnp.float32), params["b2"].astype(jnp.float32),
               w3p, b3p)

    flops = 2 * B * (in_dim * fc1 + fc1 * fc2 + fc2 * n_pad)
    bytes_accessed = 4 * (B * in_dim + B * n_pad
                          + in_dim * fc1 + fc1
                          + fc1 * fc2 + fc2
                          + fc2 * n_pad + n_pad)

    out_padded = pl.pallas_call(
        _mlp_kernel,
        out_shape=jax.ShapeDtypeStruct((B, n_pad), jnp.float32),
        grid=grid,
        in_specs=[batch_spec(in_dim)] + [resident_spec(a) for a in weights],
        out_specs=pl.BlockSpec((tb, n_pad), lambda i: (i, 0), memory_space=vmem),
        compiler_params=pltpu.CompilerParams(
            dimension_semantics=("parallel",)),
        cost_estimate=pl.CostEstimate(
            flops=flops, transcendentals=0, bytes_accessed=bytes_accessed),
    )(obs, *weights)

    return out_padded[:, :n_ret]


def init_params(key, input_dim, fc1_dims, fc2_dims, n_returns):
    """Deterministic init mimicking nn.Linear default (U(-1/sqrt(fan_in), +))."""
    def linear(k, fan_in, fan_out):
        kw, kb = jax.random.split(k)
        bound = 1.0 / jnp.sqrt(fan_in)
        w = jax.random.uniform(kw, (fan_in, fan_out), jnp.float32, -bound, bound)
        b = jax.random.uniform(kb, (1, fan_out), jnp.float32, -bound, bound)
        return w, b

    k1, k2, k3 = jax.random.split(key, 3)
    w1, b1 = linear(k1, input_dim, fc1_dims)
    w2, b2 = linear(k2, fc1_dims, fc2_dims)
    w3, b3 = linear(k3, fc2_dims, n_returns)
    return {"w1": w1, "b1": b1, "w2": w2, "b2": b2, "w3": w3, "b3": b3}


def _reference(obs, p):
    x = _leaky_relu(obs @ p["w1"] + p["b1"])
    x = _leaky_relu(x @ p["w2"] + p["b2"])
    x = _leaky_relu(x @ p["w3"] + p["b3"])
    return x


if __name__ == "__main__":
    key = jax.random.PRNGKey(0)
    k_obs, k_par = jax.random.split(key)

    # Small shapes consistent with the module: observation = (wealth, time_left)
    batch = 16
    input_dim = 2       # input_dims = (2,)
    fc1_dims = 32
    fc2_dims = 32
    n_returns = 8

    obs = jax.random.normal(k_obs, (batch, input_dim), jnp.float32)
    params = init_params(k_par, input_dim, fc1_dims, fc2_dims, n_returns)

    # block_b=8 here to exercise the multi-step batch grid at this tiny size;
    # production callers keep the default (1024) for large batches.
    out = value_func_network_forward(obs, params, block_b=8)
    out = jax.block_until_ready(out)

    ref = _reference(obs, params)
    assert out.shape == (batch, n_returns)
    assert jnp.allclose(out, ref, atol=1e-5, rtol=1e-5)

    print("KERNEL_OK")
</pallas_src>

<mosaic_0001>
module attributes {stable_mosaic.version = 11 : i64} {
  func.func @_mlp_kernel(%arg0: i32, %arg1: memref<8x2xf32, #tpu.memory_space<vmem>>, %arg2: memref<2x32xf32, #tpu.memory_space<vmem>>, %arg3: memref<1x32xf32, #tpu.memory_space<vmem>>, %arg4: memref<32x32xf32, #tpu.memory_space<vmem>>, %arg5: memref<1x32xf32, #tpu.memory_space<vmem>>, %arg6: memref<32x128xf32, #tpu.memory_space<vmem>>, %arg7: memref<1x128xf32, #tpu.memory_space<vmem>>, %arg8: memref<8x128xf32, #tpu.memory_space<vmem>>) attributes {dimension_semantics = [#tpu.dimension_semantics<parallel>], iteration_bounds = array<i64: 2>, scalar_prefetch = 0 : i64, scratch_operands = 0 : i64, tpu.core_type = #tpu.core_type<tc>, window_params = [{transform_indices = @transform_0, window_bounds = array<i64: 8, 2>}, {pipeline_mode = #tpu.pipeline_mode<synchronous>, transform_indices = @transform_1, window_bounds = array<i64: 2, 32>}, {pipeline_mode = #tpu.pipeline_mode<synchronous>, transform_indices = @transform_2, window_bounds = array<i64: 1, 32>}, {pipeline_mode = #tpu.pipeline_mode<synchronous>, transform_indices = @transform_3, window_bounds = array<i64: 32, 32>}, {pipeline_mode = #tpu.pipeline_mode<synchronous>, transform_indices = @transform_4, window_bounds = array<i64: 1, 32>}, {pipeline_mode = #tpu.pipeline_mode<synchronous>, transform_indices = @transform_5, window_bounds = array<i64: 32, 128>}, {pipeline_mode = #tpu.pipeline_mode<synchronous>, transform_indices = @transform_6, window_bounds = array<i64: 1, 128>}, {transform_indices = @transform_7, window_bounds = array<i64: 8, 128>}]} {
    %c0 = arith.constant 0 : index
    %c0_0 = arith.constant 0 : index
    %0 = vector.load %arg1[%c0, %c0_0] : memref<8x2xf32, #tpu.memory_space<vmem>>, vector<8x2xf32>
    %c0_1 = arith.constant 0 : index
    %c0_2 = arith.constant 0 : index
    %1 = vector.load %arg2[%c0_1, %c0_2] : memref<2x32xf32, #tpu.memory_space<vmem>>, vector<2x32xf32>
    %2 = vector.extract_strided_slice %0 {offsets = [0, 0], sizes = [8, 1], strides = [1, 1]} : vector<8x2xf32> to vector<8x1xf32>
    %3 = vector.extract_strided_slice %1 {offsets = [0, 0], sizes = [1, 32], strides = [1, 1]} : vector<2x32xf32> to vector<1x32xf32>
    %4 = vector.broadcast %2 : vector<8x1xf32> to vector<8x32xf32>
    %5 = vector.broadcast %3 : vector<1x32xf32> to vector<8x32xf32>
    %6 = arith.mulf %4, %5 : vector<8x32xf32>
    %7 = vector.extract_strided_slice %0 {offsets = [0, 1], sizes = [8, 1], strides = [1, 1]} : vector<8x2xf32> to vector<8x1xf32>
    %8 = vector.extract_strided_slice %1 {offsets = [1, 0], sizes = [1, 32], strides = [1, 1]} : vector<2x32xf32> to vector<1x32xf32>
    %9 = vector.broadcast %7 : vector<8x1xf32> to vector<8x32xf32>
    %10 = vector.broadcast %8 : vector<1x32xf32> to vector<8x32xf32>
    %11 = arith.mulf %9, %10 : vector<8x32xf32>
    %12 = arith.addf %6, %11 : vector<8x32xf32>
    %c0_3 = arith.constant 0 : index
    %c0_4 = arith.constant 0 : index
    %13 = vector.load %arg3[%c0_3, %c0_4] : memref<1x32xf32, #tpu.memory_space<vmem>>, vector<1x32xf32>
    %14 = vector.broadcast %13 : vector<1x32xf32> to vector<8x32xf32>
    %15 = arith.addf %12, %14 : vector<8x32xf32>
    %cst = arith.constant 0.000000e+00 : f32
    %16 = vector.broadcast %cst : f32 to vector<8x32xf32>
    %17 = arith.cmpf oge, %15, %16 : vector<8x32xf32>
    %cst_5 = arith.constant 0.00999999977 : f32
    %18 = vector.broadcast %cst_5 : f32 to vector<8x32xf32>
    %19 = arith.mulf %18, %15 : vector<8x32xf32>
    %20 = arith.select %17, %15, %19 : vector<8x32xi1>, vector<8x32xf32>
    %c0_6 = arith.constant 0 : index
    %c0_7 = arith.constant 0 : index
    %21 = vector.load %arg4[%c0_6, %c0_7] : memref<32x32xf32, #tpu.memory_space<vmem>>, vector<32x32xf32>
    %cst_8 = arith.constant dense<0.000000e+00> : vector<8x32xf32>
    %22 = tpu.matmul %20, %21, %cst_8 {dimension_numbers = #tpu.dot_dimension_numbers<[1], [0], [0], [1], [0, 0, 1, 1], [], []>} : vector<8x32xf32>, vector<32x32xf32>, vector<8x32xf32> -> vector<8x32xf32>
    %c0_9 = arith.constant 0 : index
    %c0_10 = arith.constant 0 : index
    %23 = vector.load %arg5[%c0_9, %c0_10] : memref<1x32xf32, #tpu.memory_space<vmem>>, vector<1x32xf32>
    %24 = vector.broadcast %23 : vector<1x32xf32> to vector<8x32xf32>
    %25 = arith.addf %22, %24 : vector<8x32xf32>
    %cst_11 = arith.constant 0.000000e+00 : f32
    %26 = vector.broadcast %cst_11 : f32 to vector<8x32xf32>
    %27 = arith.cmpf oge, %25, %26 : vector<8x32xf32>
    %cst_12 = arith.constant 0.00999999977 : f32
    %28 = vector.broadcast %cst_12 : f32 to vector<8x32xf32>
    %29 = arith.mulf %28, %25 : vector<8x32xf32>
    %30 = arith.select %27, %25, %29 : vector<8x32xi1>, vector<8x32xf32>
    %c0_13 = arith.constant 0 : index
    %c0_14 = arith.constant 0 : index
    %31 = vector.load %arg6[%c0_13, %c0_14] : memref<32x128xf32, #tpu.memory_space<vmem>>, vector<32x128xf32>
    %cst_15 = arith.constant dense<0.000000e+00> : vector<8x128xf32>
    %32 = tpu.matmul %30, %31, %cst_15 {dimension_numbers = #tpu.dot_dimension_numbers<[1], [0], [0], [1], [0, 0, 1, 1], [], []>} : vector<8x32xf32>, vector<32x128xf32>, vector<8x128xf32> -> vector<8x128xf32>
    %c0_16 = arith.constant 0 : index
    %c0_17 = arith.constant 0 : index
    %33 = vector.load %arg7[%c0_16, %c0_17] : memref<1x128xf32, #tpu.memory_space<vmem>>, vector<1x128xf32>
    %34 = vector.broadcast %33 : vector<1x128xf32> to vector<8x128xf32>
    %35 = arith.addf %32, %34 : vector<8x128xf32>
    %cst_18 = arith.constant 0.000000e+00 : f32
    %36 = vector.broadcast %cst_18 : f32 to vector<8x128xf32>
    %37 = arith.cmpf oge, %35, %36 : vector<8x128xf32>
    %cst_19 = arith.constant 0.00999999977 : f32
    %38 = vector.broadcast %cst_19 : f32 to vector<8x128xf32>
    %39 = arith.mulf %38, %35 : vector<8x128xf32>
    %40 = arith.select %37, %35, %39 : vector<8x128xi1>, vector<8x128xf32>
    %c0_20 = arith.constant 0 : index
    %c0_21 = arith.constant 0 : index
    %41 = vector.load %arg8[%c0_20, %c0_21] : memref<8x128xf32, #tpu.memory_space<vmem>>, vector<8x128xf32>
    tpu.vector_store %arg8[%c0_20, %c0_21], %40 {strides = array<i32>} : memref<8x128xf32, #tpu.memory_space<vmem>>, vector<8x128xf32>,
    return
  }
  func.func @transform_0(%arg0: i32) -> (i32, i32) {
    %c0_i32 = arith.constant 0 : i32
    %c0_i32_0 = arith.constant 0 : i32
    return %arg0, %c0_i32 : i32, i32
  }
  func.func @transform_1(%arg0: i32) -> (i32, i32) {
    %c0_i32 = arith.constant 0 : i32
    %c0_i32_0 = arith.constant 0 : i32
    %c0_i32_1 = arith.constant 0 : i32
    return %c0_i32, %c0_i32_0 : i32, i32
  }
  func.func @transform_2(%arg0: i32) -> (i32, i32) {
    %c0_i32 = arith.constant 0 : i32
    %c0_i32_0 = arith.constant 0 : i32
    %c0_i32_1 = arith.constant 0 : i32
    return %c0_i32, %c0_i32_0 : i32, i32
  }
  func.func @transform_3(%arg0: i32) -> (i32, i32) {
    %c0_i32 = arith.constant 0 : i32
    %c0_i32_0 = arith.constant 0 : i32
    %c0_i32_1 = arith.constant 0 : i32
    return %c0_i32, %c0_i32_0 : i32, i32
  }
  func.func @transform_4(%arg0: i32) -> (i32, i32) {
    %c0_i32 = arith.constant 0 : i32
    %c0_i32_0 = arith.constant 0 : i32
    %c0_i32_1 = arith.constant 0 : i32
    return %c0_i32, %c0_i32_0 : i32, i32
  }
  func.func @transform_5(%arg0: i32) -> (i32, i32) {
    %c0_i32 = arith.constant 0 : i32
    %c0_i32_0 = arith.constant 0 : i32
    %c0_i32_1 = arith.constant 0 : i32
    return %c0_i32, %c0_i32_0 : i32, i32
  }
  func.func @transform_6(%arg0: i32) -> (i32, i32) {
    %c0_i32 = arith.constant 0 : i32
    %c0_i32_0 = arith.constant 0 : i32
    %c0_i32_1 = arith.constant 0 : i32
    return %c0_i32, %c0_i32_0 : i32, i32
  }
  func.func @transform_7(%arg0: i32) -> (i32, i32) {
    %c0_i32 = arith.constant 0 : i32
    %c0_i32_0 = arith.constant 0 : i32
    return %arg0, %c0_i32 : i32, i32
  }
}

</mosaic_0001>

<bundles_post_ra>
// kernel: value_func_network_forward.1
= control target key start
LH: loop header
LB: loop body
LE: loop exit
PB: predicated region body
PF: predicated region fallthrough
CT: control target
= control target key end

     0   :  { %s662_s24 = smov 0   ;;  %s722_s0 = inlined_call_operand.vmem [shape: f32[16,2], index: 0, kind: input, shape index: {}]   ;;  %s723_s1 = inlined_call_operand.vmem [shape: f32[2,32], index: 1, kind: input, shape index: {}]   ;;  %s724_s2 = inlined_call_operand.vmem [shape: f32[1,32], index: 2, kind: input, shape index: {}]   ;;  %s725_s3 = inlined_call_operand.vmem [shape: f32[32,32], index: 3, kind: input, shape index: {}]   ;;  %s726_s4 = inlined_call_operand.vmem [shape: f32[1,32], index: 4, kind: input, shape index: {}]   ;;  %s727_s5 = inlined_call_operand.vmem [shape: f32[32,128], index: 5, kind: input, shape index: {}]   ;;  %s728_s6 = inlined_call_operand.vmem [shape: f32[1,128], index: 6, kind: input, shape index: {}]   ;;  %s729_s7 = inlined_call_operand.vmem [shape: f32[16,128], index: 7, kind: output, shape index: {}]  }
   0x1 LB: > { %s536_s25 = sadd.s32 4294967295, %s615_s24   ;;  %p540_p0 = scmp.ge.s32.totalorder %s615_s24, 1  ;;  %s615_s24 = sphi %s662_s24, %s17_s24  }
   0x2   : > { %p236_p1 = scmp.lt.s32.totalorder %s615_s24, 3 }
   0x4   : > { %p237_p2 = pnand %p540_p0, %p236_p1 }
   0x5   : > { %p266_p3 = scmp.lt.s32.totalorder (!%p237_p2), %s536_s25, 1  ;;  %v617_v0 = vmov (!%p237_p2), 0   ;;  %v618_v2 = vmov (!%p237_p2), 1   ;;  %v307_v3 = vld [vmem:[%s725_s3] sm:$0xff] (!%p237_p2)  ;;  %v308_v4 = vld [vmem:[%s725_s3 + $0x8] sm:$0xff] (!%p237_p2)  ;;  %v619_v6 = vmov (!%p237_p2), 0.0|0.0   ;;  %v281_v14 = vlaneseq (!%p237_p2) }
   0x6   : > { %240 = sbr.rel (%p237_p2) target bundleno = 594 (0x252), region = 48  ;;  %607 = vset.pattern.permute.xlu0 (!%p237_p2), %v617_v0  ;;  %v583_v5 = vpack.c.bf16 (!%p237_p2), %v308_v4, %v307_v3  ;;  %582 = vmatprep.subr.bf16.mxu0 (!%p237_p2), %v619_v6  ;;  %v309_v7 = vld [vmem:[%s725_s3 + $0x10] sm:$0xff] (!%p237_p2)  ;;  %v310_v8 = vld [vmem:[%s725_s3 + $0x18] sm:$0xff] (!%p237_p2)  ;;  %vm620_vm0 = vmmov (!%p237_p2), 0   ;;  %v621_v10 = vmov (!%p237_p2), 0.0   ;;  %v395_v11 = vld [vmem:[%s727_s5] sm:$0xff] (!%p237_p2) }
   0x7   : > { %588 = vmatprep.subr.bf16.mxu1 (!%p237_p2), %v619_v6  ;;  %v586_v9 = vpack.c.bf16 (!%p237_p2), %v310_v8, %v309_v7  ;;  %568 = vmatprep.mubr.msk.f32.mxu0 (!%p237_p2), %vm620_vm0, %v621_v10  ;;  %v396_v12 = vld [vmem:[%s727_s5 + $0x8] sm:$0xff] (!%p237_p2)  ;;  %v282_v15 = vshrl.u32 (!%p237_p2), %v281_v14, 7  ;;  %v275_v18 = vld [vmem:[%s723_s1] sm:$0x3] (!%p237_p2)  ;;  %vm318_vm2 = vcmask (!%p237_p2), 261120   ;;  %v397_v30 = vld [vmem:[%s727_s5 + $0x10] sm:$0xff] (!%p237_p2) }
   0x8   : > { %584 = vmatpush3.bf16.msra.mxu0 (!%p237_p2), %v583_v5  ;;  %579 = vmatprep.mubr.msk.f32.mxu1 (!%p237_p2), %vm620_vm0, %v621_v10  ;;  %v589_v13 = vpack.c.bf16 (!%p237_p2), %v396_v12, %v395_v11  ;;  %v543_v25 = vld [vmem:[%s724_s2] ss:$0 sm:$0xff] (!%p237_p2)  ;;  %v398_v31 = vld [vmem:[%s727_s5 + $0x18] sm:$0xff] (!%p237_p2) }
   0x9   : > { %585 = vmatprep.subr.bf16.mxu0 (!%p237_p2), %v619_v6  ;;  %v283_v16 = vsub.s32 (!%p237_p2), 0, %v282_v15  ;;  %v292_v17 = vsub.s32 (!%p237_p2), 1, %v282_v15  ;;  %v592_v32 = vpack.c.bf16 (!%p237_p2), %v398_v31, %v397_v30  ;;  %v544_v33 = vld [vmem:[%s726_s4] ss:$0 sm:$0xff] (!%p237_p2) }
   0xa   : > { %590 = vmatpush3.bf16.msra.mxu1 (!%p237_p2), %v589_v13  ;;  %v546_v39 = vld [vmem:[%s728_s6] ss:$0 sm:$0xff] (!%p237_p2) }
   0xb   : > { %591 = vmatprep.subr.bf16.mxu1 (!%p237_p2), %v619_v6  ;;  %v284_v20 = vrot.slane (!%p237_p2), %v275_v18, %v283_v16  ;;  %v293_v21 = vrot.slane (!%p237_p2), %v275_v18, %v292_v17 }
   0xc   : > { %587 = vmatpush3.bf16.msra.mxu0 (!%p237_p2), %v586_v9 }
   0xd   : > { %s731_s25 = smov (!%p266_p3, %s536_s25), 1 }
   0xe   : > { %s541_s26 = sshll.u32 %s731_s25, 3  ;;  %593 = vmatpush3.bf16.msra.mxu1 %v592_v32 }
   0xf   : > { %s269_s29 = scalar_lea.vmem %s722_s0, %s541_s26  ;;  %s273_s13 = scalar_lea.vmem %s729_s7, %s541_s26 }
  0x10   : > { %v274_v1 = vld [vmem:[%s269_s29] sm:$0xff] }
  0x11   : > { %278 = vperm.xlu0 %607, %v274_v1  }
  0x15   : > { %608 = vset.pattern.permute.xlu0 %v618_v2 }
  0x16   : > { %287 = vperm.xlu0 %608, %v274_v1  }
  0x90   : > { %v279_v19 = vpop.permute.xlu0 %278 }
  0x91   : > { %v285_v23 = vmul.f32 %v284_v20, %v279_v19 }
  0x95   : > { %v288_v22 = vpop.permute.xlu0 %287 }
  0x96   : > { %v294_v24 = vmul.f32 %v293_v21, %v288_v22 }
  0x98   : > { %v295_v26 = vadd.f32 %v294_v24, %v285_v23 }
  0x9a   : > { %v303_v27 = vadd.f32 %v543_v25, %v295_v26 }
  0x9c   : > { %vm304_vm1 = vcmp.ge.f32.partialorder %v303_v27, 0.0  ;;  %v305_v28 = vmul.f32 0.01, %v303_v27 }
  0x9e   : > { %v306_v29 = vsel %vm304_vm1, %v303_v27, %v305_v28 }
  0x9f   : > { %569 = vmatmul.mubr.msk.f32.vlgmr.msra.gmra.mrb[0].mxu0 %vm318_vm2, %v306_v29 }
 0x172   : > { %v388_v34 = vpop.f32.mrb[0].mxu0 }
 0x173   : > { %v389_v35 = vadd.f32 %v544_v33, %v388_v34  ;;  %v570_v36 = vpop.f32.mrb[1].mxu0 }
 0x175   : > { %vm392_vm3 = vcmp.ge.f32.partialorder %v389_v35, 0.0  ;;  %v393_v37 = vmul.f32 0.01, %v389_v35 }
 0x177   : > { %v394_v38 = vsel %vm392_vm3, %v389_v35, %v393_v37 }
 0x178   : > { %580 = vmatmul.mubr.msk.f32.vlgmr.msra.gmra.mrb[0].mxu1 %vm318_vm2, %v394_v38 }
 0x24b   : > { %v475_v40 = vpop.f32.mrb[0].mxu1 }
 0x24c   : > { %v476_v41 = vadd.f32 %v546_v39, %v475_v40  ;;  %v581_v42 = vpop.f32.mrb[1].mxu1 }
 0x24e   : > { %vm479_vm4 = vcmp.ge.f32.partialorder %v476_v41, 0.0  ;;  %v480_v43 = vmul.f32 0.01, %v476_v41 }
 0x250   : > { %v481_v44 = vsel %vm479_vm4, %v476_v41, %v480_v43 }
 0x251   : > { %482 = vst [vmem:[%s273_s13] sm:$0xff] %v481_v44 }
 0x252 PF: > { %s17_s24 = sadd.s32 1, %s615_s24  }
 0x253   : > { %p14_p4 = scmp.ge.s32.totalorder %s17_s24, 4  }
 0x255   :  { %16 = sbr.rel (!%p14_p4) target bundleno = 1 (0x1), region = 78 }

</bundles_post_ra>
